<compile_context>
chip_gen: v7x
topology: tpu7x:2x2x1
jax: 0.10.0
libtpu: 0.0.40
codegen_flags: <defaults>
</compile_context>

<pallas_src>
import functools

import jax
import jax.numpy as jnp
from jax.experimental import pallas as pl
from jax.experimental.pallas import tpu as pltpu


def _round_up(x, m):
    return ((x + m - 1) // m) * m


def _transition_kernel(x_ref, w_ref, b_ref, ln_w_ref, ln_b_ref, o_ref, *,
                       no_layers, eps):
    # x_ref     : [TILE_N, C]            one row tile of the batch*seq rows
    # w_ref     : [no_layers, 3, C, C]   bf16/f32, VMEM-resident (y = x @ W)
    # b_ref     : [no_layers*3, C]       f32, resident
    # ln_w/ln_b : [1, C]                 f32, resident
    x = x_ref[...].astype(jnp.float32)
    cdt = w_ref.dtype

    # no_layers x (Linear -> ReLU -> Linear -> ReLU -> Linear) + residual.
    for l in range(no_layers):            # static unroll; no_layers is small
        h = x
        for j in range(3):
            h = jnp.dot(h.astype(cdt), w_ref[l, j],
                        preferred_element_type=jnp.float32)
            h = h + b_ref[3 * l + j:3 * l + j + 1, :]      # (1, C) row, f32
            if j < 2:
                h = jnp.maximum(h, 0.0)
        x = x + h

    # Dropout: inference mode => identity.
    # TODO(synk): training-mode dropout would use pltpu.prng_seed + prng_random_bits.

    # LayerNorm over the full (unpadded) channel dim — no lane mask needed.
    inv_c = 1.0 / float(x.shape[-1])
    mean = jnp.sum(x, axis=-1, keepdims=True) * inv_c
    centered = x - mean
    var = jnp.sum(centered * centered, axis=-1, keepdims=True) * inv_c
    out = centered * jax.lax.rsqrt(var + eps) * ln_w_ref[...] + ln_b_ref[...]
    o_ref[...] = out.astype(o_ref.dtype)


def transition_forward(s, weights, biases, ln_weight, ln_bias, *, eps=1e-5,
                       compute_dtype=jnp.bfloat16, tile_n=2048):
    """s: [batch, seq, c_in] f32.
    weights: [no_layers, 3, c_in, c_in]  (pre-transposed: y = x @ W)
    biases:  [no_layers, 3, 1, c_in]
    ln_weight, ln_bias: [1, c_in]
    """
    batch, seq, c_in = s.shape
    no_layers = weights.shape[0]
    n = batch * seq

    # Channel dim stays unpadded: for production C (multiples of 128) the layout
    # is already lane-dense, and this removes the zero-pad + output-slice HBM
    # round trips entirely. Free reshapes only for the activations.
    x2d = s.reshape(n, c_in)

    w = weights.astype(compute_dtype)                               # tiny copies
    b = biases.reshape(no_layers * 3, c_in).astype(jnp.float32)
    lnw = ln_weight.reshape(1, c_in).astype(jnp.float32)
    lnb = ln_bias.reshape(1, c_in).astype(jnp.float32)

    w_bytes = int(w.size) * jnp.dtype(compute_dtype).itemsize
    small_bytes = 4 * int(b.size + lnw.size + lnb.size)

    # Per-generation VMEM capacity (v5e/v6e: 128 MiB, v7x: 64 MiB per TC).
    try:
        vmem_cap = int(pltpu.get_tpu_info().vmem_capacity_bytes)
    except Exception:
        vmem_cap = 64 * 1024 * 1024

    def tile_vmem(t):
        tb = t * c_in * 4
        # single-buffered resident params + double-buffered in/out row tiles +
        # ~8 live f32 full-tile temporaries from the statically unrolled layers.
        return w_bytes + small_bytes + 4 * tb + 8 * tb

    # Row tile: start big (amortize per-grid-step overhead, long DMA bursts),
    # shrink to the per-chip VMEM budget, keep a multiple of 8 sublanes.
    tile = max(8, _round_up(min(tile_n, _round_up(n, 8)), 8))
    budget = int(vmem_cap * 0.8)
    while tile > 256 and tile_vmem(tile) > budget:
        tile = max(256, _round_up(tile // 2, 8))

    # v7x megacore: dimension_semantics=("parallel",) shards row tiles across
    # the 2 TensorCores -> prefer >= 2 (and an even number of) tiles for big N.
    if n >= 4096:
        num_tiles = pl.cdiv(n, tile)
        if num_tiles < 2 or (num_tiles % 2 == 1):
            num_tiles = max(2, num_tiles + (num_tiles % 2))
            tile = max(256, _round_up(pl.cdiv(n, num_tiles), 8))

    grid = (pl.cdiv(n, tile),)   # ragged last row tile: rows are independent,
                                 # OOB reads are per-row garbage, OOB writes dropped.

    vmem_limit = int(min(vmem_cap - (8 << 20),
                         max(tile_vmem(tile) * 5 // 4, 32 << 20)))
    vmem_limit = max(vmem_limit, 16 << 20)

    cost = pl.CostEstimate(
        flops=2 * n * c_in * c_in * 3 * no_layers,
        transcendentals=n,
        bytes_accessed=n * c_in * (s.dtype.itemsize + s.dtype.itemsize)
                       + w_bytes + small_bytes,
    )

    kernel = functools.partial(_transition_kernel, no_layers=no_layers, eps=eps)

    def build_call(single_buffer_residents):
        def resident(shape):
            nd = len(shape)

            def idx(i, _nd=nd):
                return (0,) * _nd

            if single_buffer_residents:
                # Constant index_map -> never re-fetched; one buffer is enough.
                return pl.BlockSpec(shape, idx, pipeline_mode=pl.Buffered(1))
            return pl.BlockSpec(shape, idx)

        return pl.pallas_call(
            kernel,
            out_shape=jax.ShapeDtypeStruct((n, c_in), s.dtype),
            grid=grid,
            in_specs=[
                pl.BlockSpec((tile, c_in), lambda i: (i, 0)),     # x row tiles
                resident((no_layers, 3, c_in, c_in)),             # W resident
                resident((no_layers * 3, c_in)),                  # b resident
                resident((1, c_in)),                              # ln_w
                resident((1, c_in)),                              # ln_b
            ],
            out_specs=pl.BlockSpec((tile, c_in), lambda i: (i, 0)),
            compiler_params=pltpu.CompilerParams(
                dimension_semantics=("parallel",),
                vmem_limit_bytes=vmem_limit,
            ),
            cost_estimate=cost,
        )

    try:
        out2d = jax.block_until_ready(build_call(True)(x2d, w, b, lnw, lnb))
    except Exception:
        # Fallback if this JAX build rejects pl.Buffered(1) single-buffering.
        out2d = build_call(False)(x2d, w, b, lnw, lnb)

    return out2d.reshape(batch, seq, c_in)    # free reshape, no copy


def _reference_forward(s, weights, biases, ln_weight, ln_bias, *, eps=1e-5,
                       compute_dtype=jnp.bfloat16):
    """Pure-JAX reference mirroring the module (eval mode) with the same
    bf16-matmul / f32-accumulate discipline as the kernel."""
    x = s.astype(jnp.float32)
    w = weights.astype(compute_dtype)
    for l in range(weights.shape[0]):
        h = x
        for j in range(3):
            h = jnp.dot(h.astype(compute_dtype), w[l, j],
                        preferred_element_type=jnp.float32) + biases[l, j, 0]
            if j < 2:
                h = jnp.maximum(h, 0.0)
        x = x + h
    mean = jnp.mean(x, axis=-1, keepdims=True)
    var = jnp.mean((x - mean) ** 2, axis=-1, keepdims=True)
    return (x - mean) / jnp.sqrt(var + eps) * ln_weight[0] + ln_bias[0]


if __name__ == "__main__":
    key = jax.random.PRNGKey(0)
    batch, seq, c_in = 2, 8, 32
    no_layers = 2

    k_s, k_w, k_b, k_g, k_beta = jax.random.split(key, 5)
    s = jax.random.normal(k_s, (batch, seq, c_in), dtype=jnp.float32)

    # Deterministic synthetic parameters (he-like scale for the 'relu' inits;
    # the 'final'-init linear would be zeros in the real module, but forward
    # semantics do not depend on the particular values).
    weights = jax.random.normal(k_w, (no_layers, 3, c_in, c_in), dtype=jnp.float32) * (
        1.0 / jnp.sqrt(c_in)
    )
    biases = jax.random.normal(k_b, (no_layers, 3, 1, c_in), dtype=jnp.float32) * 0.01
    ln_weight = 1.0 + 0.1 * jax.random.normal(k_g, (1, c_in), dtype=jnp.float32)
    ln_bias = 0.01 * jax.random.normal(k_beta, (1, c_in), dtype=jnp.float32)

    out = transition_forward(s, weights, biases, ln_weight, ln_bias)
    out = jax.block_until_ready(out)

    ref = _reference_forward(s, weights, biases, ln_weight, ln_bias)
    assert out.shape == (batch, seq, c_in)
    assert jnp.allclose(out, ref, atol=2e-3, rtol=2e-3), "mismatch vs reference"

    print("KERNEL_OK")
</pallas_src>

<mosaic_0001>
module attributes {stable_mosaic.version = 11 : i64} {
  func.func @_transition_kernel(%arg0: i32, %arg1: memref<16x32xf32, #tpu.memory_space<vmem>>, %arg2: memref<2x3x32x32xbf16, #tpu.memory_space<vmem>>, %arg3: memref<6x32xf32, #tpu.memory_space<vmem>>, %arg4: memref<1x32xf32, #tpu.memory_space<vmem>>, %arg5: memref<1x32xf32, #tpu.memory_space<vmem>>, %arg6: memref<16x32xf32, #tpu.memory_space<vmem>>) attributes {dimension_semantics = [#tpu.dimension_semantics<parallel>], iteration_bounds = array<i64: 1>, scalar_prefetch = 0 : i64, scratch_operands = 0 : i64, tpu.core_type = #tpu.core_type<tc>, window_params = [{transform_indices = @transform_0, window_bounds = array<i64: 16, 32>}, {pipeline_mode = #tpu.pipeline_mode<synchronous>, transform_indices = @transform_1, window_bounds = array<i64: 2, 3, 32, 32>}, {pipeline_mode = #tpu.pipeline_mode<synchronous>, transform_indices = @transform_2, window_bounds = array<i64: 6, 32>}, {pipeline_mode = #tpu.pipeline_mode<synchronous>, transform_indices = @transform_3, window_bounds = array<i64: 1, 32>}, {pipeline_mode = #tpu.pipeline_mode<synchronous>, transform_indices = @transform_4, window_bounds = array<i64: 1, 32>}, {transform_indices = @transform_5, window_bounds = array<i64: 16, 32>}]} {
    %c0 = arith.constant 0 : index
    %c0_0 = arith.constant 0 : index
    %0 = vector.load %arg1[%c0, %c0_0] : memref<16x32xf32, #tpu.memory_space<vmem>>, vector<16x32xf32>
    %1 = arith.truncf %0 : vector<16x32xf32> to vector<16x32xbf16>
    %c0_1 = arith.constant 0 : index
    %c0_2 = arith.constant 0 : index
    %c0_3 = arith.constant 0 : index
    %c0_4 = arith.constant 0 : index
    %2 = vector.load %arg2[%c0_1, %c0_2, %c0_3, %c0_4] : memref<2x3x32x32xbf16, #tpu.memory_space<vmem>>, vector<1x1x32x32xbf16>
    %3 = vector.shape_cast %2 : vector<1x1x32x32xbf16> to vector<32x32xbf16>
    %cst = arith.constant dense<0.000000e+00> : vector<16x32xf32>
    %4 = tpu.matmul %1, %3, %cst {dimension_numbers = #tpu.dot_dimension_numbers<[1], [0], [0], [1], [0, 0, 1, 1], [], []>} : vector<16x32xbf16>, vector<32x32xbf16>, vector<16x32xf32> -> vector<16x32xf32>
    %c0_5 = arith.constant 0 : index
    %c0_6 = arith.constant 0 : index
    %5 = vector.load %arg3[%c0_5, %c0_6] : memref<6x32xf32, #tpu.memory_space<vmem>>, vector<1x32xf32>
    %6 = vector.broadcast %5 : vector<1x32xf32> to vector<16x32xf32>
    %7 = arith.addf %4, %6 : vector<16x32xf32>
    %cst_7 = arith.constant 0.000000e+00 : f32
    %8 = vector.broadcast %cst_7 : f32 to vector<16x32xf32>
    %9 = arith.maximumf %7, %8 : vector<16x32xf32>
    %10 = arith.truncf %9 : vector<16x32xf32> to vector<16x32xbf16>
    %c0_8 = arith.constant 0 : index
    %c1 = arith.constant 1 : index
    %c0_9 = arith.constant 0 : index
    %c0_10 = arith.constant 0 : index
    %11 = vector.load %arg2[%c0_8, %c1, %c0_9, %c0_10] : memref<2x3x32x32xbf16, #tpu.memory_space<vmem>>, vector<1x1x32x32xbf16>
    %12 = vector.shape_cast %11 : vector<1x1x32x32xbf16> to vector<32x32xbf16>
    %cst_11 = arith.constant dense<0.000000e+00> : vector<16x32xf32>
    %13 = tpu.matmul %10, %12, %cst_11 {dimension_numbers = #tpu.dot_dimension_numbers<[1], [0], [0], [1], [0, 0, 1, 1], [], []>} : vector<16x32xbf16>, vector<32x32xbf16>, vector<16x32xf32> -> vector<16x32xf32>
    %c1_12 = arith.constant 1 : index
    %c0_13 = arith.constant 0 : index
    %14 = vector.load %arg3[%c1_12, %c0_13] : memref<6x32xf32, #tpu.memory_space<vmem>>, vector<1x32xf32>
    %15 = vector.broadcast %14 : vector<1x32xf32> to vector<16x32xf32>
    %16 = arith.addf %13, %15 : vector<16x32xf32>
    %cst_14 = arith.constant 0.000000e+00 : f32
    %17 = vector.broadcast %cst_14 : f32 to vector<16x32xf32>
    %18 = arith.maximumf %16, %17 : vector<16x32xf32>
    %19 = arith.truncf %18 : vector<16x32xf32> to vector<16x32xbf16>
    %c0_15 = arith.constant 0 : index
    %c2 = arith.constant 2 : index
    %c0_16 = arith.constant 0 : index
    %c0_17 = arith.constant 0 : index
    %20 = vector.load %arg2[%c0_15, %c2, %c0_16, %c0_17] : memref<2x3x32x32xbf16, #tpu.memory_space<vmem>>, vector<1x1x32x32xbf16>
    %21 = vector.shape_cast %20 : vector<1x1x32x32xbf16> to vector<32x32xbf16>
    %cst_18 = arith.constant dense<0.000000e+00> : vector<16x32xf32>
    %22 = tpu.matmul %19, %21, %cst_18 {dimension_numbers = #tpu.dot_dimension_numbers<[1], [0], [0], [1], [0, 0, 1, 1], [], []>} : vector<16x32xbf16>, vector<32x32xbf16>, vector<16x32xf32> -> vector<16x32xf32>
    %c2_19 = arith.constant 2 : index
    %c0_20 = arith.constant 0 : index
    %23 = vector.load %arg3[%c2_19, %c0_20] : memref<6x32xf32, #tpu.memory_space<vmem>>, vector<1x32xf32>
    %24 = vector.broadcast %23 : vector<1x32xf32> to vector<16x32xf32>
    %25 = arith.addf %22, %24 : vector<16x32xf32>
    %26 = arith.addf %0, %25 : vector<16x32xf32>
    %27 = arith.truncf %26 : vector<16x32xf32> to vector<16x32xbf16>
    %c1_21 = arith.constant 1 : index
    %c0_22 = arith.constant 0 : index
    %c0_23 = arith.constant 0 : index
    %c0_24 = arith.constant 0 : index
    %28 = vector.load %arg2[%c1_21, %c0_22, %c0_23, %c0_24] : memref<2x3x32x32xbf16, #tpu.memory_space<vmem>>, vector<1x1x32x32xbf16>
    %29 = vector.shape_cast %28 : vector<1x1x32x32xbf16> to vector<32x32xbf16>
    %cst_25 = arith.constant dense<0.000000e+00> : vector<16x32xf32>
    %30 = tpu.matmul %27, %29, %cst_25 {dimension_numbers = #tpu.dot_dimension_numbers<[1], [0], [0], [1], [0, 0, 1, 1], [], []>} : vector<16x32xbf16>, vector<32x32xbf16>, vector<16x32xf32> -> vector<16x32xf32>
    %c3 = arith.constant 3 : index
    %c0_26 = arith.constant 0 : index
    %31 = vector.load %arg3[%c3, %c0_26] : memref<6x32xf32, #tpu.memory_space<vmem>>, vector<1x32xf32>
    %32 = vector.broadcast %31 : vector<1x32xf32> to vector<16x32xf32>
    %33 = arith.addf %30, %32 : vector<16x32xf32>
    %cst_27 = arith.constant 0.000000e+00 : f32
    %34 = vector.broadcast %cst_27 : f32 to vector<16x32xf32>
    %35 = arith.maximumf %33, %34 : vector<16x32xf32>
    %36 = arith.truncf %35 : vector<16x32xf32> to vector<16x32xbf16>
    %c1_28 = arith.constant 1 : index
    %c1_29 = arith.constant 1 : index
    %c0_30 = arith.constant 0 : index
    %c0_31 = arith.constant 0 : index
    %37 = vector.load %arg2[%c1_28, %c1_29, %c0_30, %c0_31] : memref<2x3x32x32xbf16, #tpu.memory_space<vmem>>, vector<1x1x32x32xbf16>
    %38 = vector.shape_cast %37 : vector<1x1x32x32xbf16> to vector<32x32xbf16>
    %cst_32 = arith.constant dense<0.000000e+00> : vector<16x32xf32>
    %39 = tpu.matmul %36, %38, %cst_32 {dimension_numbers = #tpu.dot_dimension_numbers<[1], [0], [0], [1], [0, 0, 1, 1], [], []>} : vector<16x32xbf16>, vector<32x32xbf16>, vector<16x32xf32> -> vector<16x32xf32>
    %c4 = arith.constant 4 : index
    %c0_33 = arith.constant 0 : index
    %40 = vector.load %arg3[%c4, %c0_33] : memref<6x32xf32, #tpu.memory_space<vmem>>, vector<1x32xf32>
    %41 = vector.broadcast %40 : vector<1x32xf32> to vector<16x32xf32>
    %42 = arith.addf %39, %41 : vector<16x32xf32>
    %cst_34 = arith.constant 0.000000e+00 : f32
    %43 = vector.broadcast %cst_34 : f32 to vector<16x32xf32>
    %44 = arith.maximumf %42, %43 : vector<16x32xf32>
    %45 = arith.truncf %44 : vector<16x32xf32> to vector<16x32xbf16>
    %c1_35 = arith.constant 1 : index
    %c2_36 = arith.constant 2 : index
    %c0_37 = arith.constant 0 : index
    %c0_38 = arith.constant 0 : index
    %46 = vector.load %arg2[%c1_35, %c2_36, %c0_37, %c0_38] : memref<2x3x32x32xbf16, #tpu.memory_space<vmem>>, vector<1x1x32x32xbf16>
    %47 = vector.shape_cast %46 : vector<1x1x32x32xbf16> to vector<32x32xbf16>
    %cst_39 = arith.constant dense<0.000000e+00> : vector<16x32xf32>
    %48 = tpu.matmul %45, %47, %cst_39 {dimension_numbers = #tpu.dot_dimension_numbers<[1], [0], [0], [1], [0, 0, 1, 1], [], []>} : vector<16x32xbf16>, vector<32x32xbf16>, vector<16x32xf32> -> vector<16x32xf32>
    %c5 = arith.constant 5 : index
    %c0_40 = arith.constant 0 : index
    %49 = vector.load %arg3[%c5, %c0_40] : memref<6x32xf32, #tpu.memory_space<vmem>>, vector<1x32xf32>
    %50 = vector.broadcast %49 : vector<1x32xf32> to vector<16x32xf32>
    %51 = arith.addf %48, %50 : vector<16x32xf32>
    %52 = arith.addf %26, %51 : vector<16x32xf32>
    %cst_41 = arith.constant dense<0.000000e+00> : vector<16xf32>
    %53 = vector.multi_reduction <add>, %52, %cst_41 [1] : vector<16x32xf32> to vector<16xf32>
    %54 = vector.shape_cast %53 : vector<16xf32> to vector<16x1xf32>
    %cst_42 = arith.constant 3.125000e-02 : f32
    %55 = vector.broadcast %cst_42 : f32 to vector<16x1xf32>
    %56 = arith.mulf %54, %55 : vector<16x1xf32>
    %57 = vector.broadcast %56 : vector<16x1xf32> to vector<16x32xf32>
    %58 = arith.subf %52, %57 : vector<16x32xf32>
    %59 = arith.mulf %58, %58 : vector<16x32xf32>
    %cst_43 = arith.constant dense<0.000000e+00> : vector<16xf32>
    %60 = vector.multi_reduction <add>, %59, %cst_43 [1] : vector<16x32xf32> to vector<16xf32>
    %61 = vector.shape_cast %60 : vector<16xf32> to vector<16x1xf32>
    %cst_44 = arith.constant 3.125000e-02 : f32
    %62 = vector.broadcast %cst_44 : f32 to vector<16x1xf32>
    %63 = arith.mulf %61, %62 : vector<16x1xf32>
    %cst_45 = arith.constant 9.99999974E-6 : f32
    %64 = vector.broadcast %cst_45 : f32 to vector<16x1xf32>
    %65 = arith.addf %63, %64 : vector<16x1xf32>
    %66 = math.rsqrt %65 : vector<16x1xf32>
    %67 = vector.broadcast %66 : vector<16x1xf32> to vector<16x32xf32>
    %68 = arith.mulf %58, %67 : vector<16x32xf32>
    %c0_46 = arith.constant 0 : index
    %c0_47 = arith.constant 0 : index
    %69 = vector.load %arg4[%c0_46, %c0_47] : memref<1x32xf32, #tpu.memory_space<vmem>>, vector<1x32xf32>
    %70 = vector.broadcast %69 : vector<1x32xf32> to vector<16x32xf32>
    %71 = arith.mulf %68, %70 : vector<16x32xf32>
    %c0_48 = arith.constant 0 : index
    %c0_49 = arith.constant 0 : index
    %72 = vector.load %arg5[%c0_48, %c0_49] : memref<1x32xf32, #tpu.memory_space<vmem>>, vector<1x32xf32>
    %73 = vector.broadcast %72 : vector<1x32xf32> to vector<16x32xf32>
    %74 = arith.addf %71, %73 : vector<16x32xf32>
    %c0_50 = arith.constant 0 : index
    %c0_51 = arith.constant 0 : index
    %75 = vector.load %arg6[%c0_50, %c0_51] : memref<16x32xf32, #tpu.memory_space<vmem>>, vector<16x32xf32>
    tpu.vector_store %arg6[%c0_50, %c0_51], %74 {strides = array<i32>} : memref<16x32xf32, #tpu.memory_space<vmem>>, vector<16x32xf32>,
    return
  }
  func.func @transform_0(%arg0: i32) -> (i32, i32) {
    %c0_i32 = arith.constant 0 : i32
    %c0_i32_0 = arith.constant 0 : i32
    return %arg0, %c0_i32 : i32, i32
  }
  func.func @transform_1(%arg0: i32) -> (i32, i32, i32, i32) {
    %c0_i32 = arith.constant 0 : i32
    %c0_i32_0 = arith.constant 0 : i32
    %c0_i32_1 = arith.constant 0 : i32
    %c0_i32_2 = arith.constant 0 : i32
    %c0_i32_3 = arith.constant 0 : i32
    return %c0_i32, %c0_i32_0, %c0_i32_1, %c0_i32_2 : i32, i32, i32, i32
  }
  func.func @transform_2(%arg0: i32) -> (i32, i32) {
    %c0_i32 = arith.constant 0 : i32
    %c0_i32_0 = arith.constant 0 : i32
    %c0_i32_1 = arith.constant 0 : i32
    return %c0_i32, %c0_i32_0 : i32, i32
  }
  func.func @transform_3(%arg0: i32) -> (i32, i32) {
    %c0_i32 = arith.constant 0 : i32
    %c0_i32_0 = arith.constant 0 : i32
    %c0_i32_1 = arith.constant 0 : i32
    return %c0_i32, %c0_i32_0 : i32, i32
  }
  func.func @transform_4(%arg0: i32) -> (i32, i32) {
    %c0_i32 = arith.constant 0 : i32
    %c0_i32_0 = arith.constant 0 : i32
    %c0_i32_1 = arith.constant 0 : i32
    return %c0_i32, %c0_i32_0 : i32, i32
  }
  func.func @transform_5(%arg0: i32) -> (i32, i32) {
    %c0_i32 = arith.constant 0 : i32
    %c0_i32_0 = arith.constant 0 : i32
    return %arg0, %c0_i32 : i32, i32
  }
}

module attributes {stable_mosaic.version = 11 : i64} {
  func.func @_transition_kernel(%arg0: i32, %arg1: memref<16x32xf32, #tpu.memory_space<vmem>>, %arg2: memref<2x3x32x32xbf16, #tpu.memory_space<vmem>>, %arg3: memref<6x32xf32, #tpu.memory_space<vmem>>, %arg4: memref<1x32xf32, #tpu.memory_space<vmem>>, %arg5: memref<1x32xf32, #tpu.memory_space<vmem>>, %arg6: memref<16x32xf32, #tpu.memory_space<vmem>>) attributes {dimension_semantics = [#tpu.dimension_semantics<parallel>], iteration_bounds = array<i64: 1>, scalar_prefetch = 0 : i64, scratch_operands = 0 : i64, tpu.core_type = #tpu.core_type<tc>, window_params = [{transform_indices = @transform_0, window_bounds = array<i64: 16, 32>}, {pipeline_mode = #tpu.pipeline_mode<synchronous>, transform_indices = @transform_1, window_bounds = array<i64: 2, 3, 32, 32>}, {pipeline_mode = #tpu.pipeline_mode<synchronous>, transform_indices = @transform_2, window_bounds = array<i64: 6, 32>}, {pipeline_mode = #tpu.pipeline_mode<synchronous>, transform_indices = @transform_3, window_bounds = array<i64: 1, 32>}, {pipeline_mode = #tpu.pipeline_mode<synchronous>, transform_indices = @transform_4, window_bounds = array<i64: 1, 32>}, {transform_indices = @transform_5, window_bounds = array<i64: 16, 32>}]} {
    %c0 = arith.constant 0 : index
    %c0_0 = arith.constant 0 : index
    %0 = vector.load %arg1[%c0, %c0_0] : memref<16x32xf32, #tpu.memory_space<vmem>>, vector<16x32xf32>
    %1 = arith.truncf %0 : vector<16x32xf32> to vector<16x32xbf16>
    %c0_1 = arith.constant 0 : index
    %c0_2 = arith.constant 0 : index
    %c0_3 = arith.constant 0 : index
    %c0_4 = arith.constant 0 : index
    %2 = vector.load %arg2[%c0_1, %c0_2, %c0_3, %c0_4] : memref<2x3x32x32xbf16, #tpu.memory_space<vmem>>, vector<1x1x32x32xbf16>
    %3 = vector.shape_cast %2 : vector<1x1x32x32xbf16> to vector<32x32xbf16>
    %cst = arith.constant dense<0.000000e+00> : vector<16x32xf32>
    %4 = tpu.matmul %1, %3, %cst {dimension_numbers = #tpu.dot_dimension_numbers<[1], [0], [0], [1], [0, 0, 1, 1], [], []>} : vector<16x32xbf16>, vector<32x32xbf16>, vector<16x32xf32> -> vector<16x32xf32>
    %c0_5 = arith.constant 0 : index
    %c0_6 = arith.constant 0 : index
    %5 = vector.load %arg3[%c0_5, %c0_6] : memref<6x32xf32, #tpu.memory_space<vmem>>, vector<1x32xf32>
    %6 = vector.broadcast %5 : vector<1x32xf32> to vector<16x32xf32>
    %7 = arith.addf %4, %6 : vector<16x32xf32>
    %cst_7 = arith.constant 0.000000e+00 : f32
    %8 = vector.broadcast %cst_7 : f32 to vector<16x32xf32>
    %9 = arith.maximumf %7, %8 : vector<16x32xf32>
    %10 = arith.truncf %9 : vector<16x32xf32> to vector<16x32xbf16>
    %c0_8 = arith.constant 0 : index
    %c1 = arith.constant 1 : index
    %c0_9 = arith.constant 0 : index
    %c0_10 = arith.constant 0 : index
    %11 = vector.load %arg2[%c0_8, %c1, %c0_9, %c0_10] : memref<2x3x32x32xbf16, #tpu.memory_space<vmem>>, vector<1x1x32x32xbf16>
    %12 = vector.shape_cast %11 : vector<1x1x32x32xbf16> to vector<32x32xbf16>
    %cst_11 = arith.constant dense<0.000000e+00> : vector<16x32xf32>
    %13 = tpu.matmul %10, %12, %cst_11 {dimension_numbers = #tpu.dot_dimension_numbers<[1], [0], [0], [1], [0, 0, 1, 1], [], []>} : vector<16x32xbf16>, vector<32x32xbf16>, vector<16x32xf32> -> vector<16x32xf32>
    %c1_12 = arith.constant 1 : index
    %c0_13 = arith.constant 0 : index
    %14 = vector.load %arg3[%c1_12, %c0_13] : memref<6x32xf32, #tpu.memory_space<vmem>>, vector<1x32xf32>
    %15 = vector.broadcast %14 : vector<1x32xf32> to vector<16x32xf32>
    %16 = arith.addf %13, %15 : vector<16x32xf32>
    %cst_14 = arith.constant 0.000000e+00 : f32
    %17 = vector.broadcast %cst_14 : f32 to vector<16x32xf32>
    %18 = arith.maximumf %16, %17 : vector<16x32xf32>
    %19 = arith.truncf %18 : vector<16x32xf32> to vector<16x32xbf16>
    %c0_15 = arith.constant 0 : index
    %c2 = arith.constant 2 : index
    %c0_16 = arith.constant 0 : index
    %c0_17 = arith.constant 0 : index
    %20 = vector.load %arg2[%c0_15, %c2, %c0_16, %c0_17] : memref<2x3x32x32xbf16, #tpu.memory_space<vmem>>, vector<1x1x32x32xbf16>
    %21 = vector.shape_cast %20 : vector<1x1x32x32xbf16> to vector<32x32xbf16>
    %cst_18 = arith.constant dense<0.000000e+00> : vector<16x32xf32>
    %22 = tpu.matmul %19, %21, %cst_18 {dimension_numbers = #tpu.dot_dimension_numbers<[1], [0], [0], [1], [0, 0, 1, 1], [], []>} : vector<16x32xbf16>, vector<32x32xbf16>, vector<16x32xf32> -> vector<16x32xf32>
    %c2_19 = arith.constant 2 : index
    %c0_20 = arith.constant 0 : index
    %23 = vector.load %arg3[%c2_19, %c0_20] : memref<6x32xf32, #tpu.memory_space<vmem>>, vector<1x32xf32>
    %24 = vector.broadcast %23 : vector<1x32xf32> to vector<16x32xf32>
    %25 = arith.addf %22, %24 : vector<16x32xf32>
    %26 = arith.addf %0, %25 : vector<16x32xf32>
    %27 = arith.truncf %26 : vector<16x32xf32> to vector<16x32xbf16>
    %c1_21 = arith.constant 1 : index
    %c0_22 = arith.constant 0 : index
    %c0_23 = arith.constant 0 : index
    %c0_24 = arith.constant 0 : index
    %28 = vector.load %arg2[%c1_21, %c0_22, %c0_23, %c0_24] : memref<2x3x32x32xbf16, #tpu.memory_space<vmem>>, vector<1x1x32x32xbf16>
    %29 = vector.shape_cast %28 : vector<1x1x32x32xbf16> to vector<32x32xbf16>
    %cst_25 = arith.constant dense<0.000000e+00> : vector<16x32xf32>
    %30 = tpu.matmul %27, %29, %cst_25 {dimension_numbers = #tpu.dot_dimension_numbers<[1], [0], [0], [1], [0, 0, 1, 1], [], []>} : vector<16x32xbf16>, vector<32x32xbf16>, vector<16x32xf32> -> vector<16x32xf32>
    %c3 = arith.constant 3 : index
    %c0_26 = arith.constant 0 : index
    %31 = vector.load %arg3[%c3, %c0_26] : memref<6x32xf32, #tpu.memory_space<vmem>>, vector<1x32xf32>
    %32 = vector.broadcast %31 : vector<1x32xf32> to vector<16x32xf32>
    %33 = arith.addf %30, %32 : vector<16x32xf32>
    %cst_27 = arith.constant 0.000000e+00 : f32
    %34 = vector.broadcast %cst_27 : f32 to vector<16x32xf32>
    %35 = arith.maximumf %33, %34 : vector<16x32xf32>
    %36 = arith.truncf %35 : vector<16x32xf32> to vector<16x32xbf16>
    %c1_28 = arith.constant 1 : index
    %c1_29 = arith.constant 1 : index
    %c0_30 = arith.constant 0 : index
    %c0_31 = arith.constant 0 : index
    %37 = vector.load %arg2[%c1_28, %c1_29, %c0_30, %c0_31] : memref<2x3x32x32xbf16, #tpu.memory_space<vmem>>, vector<1x1x32x32xbf16>
    %38 = vector.shape_cast %37 : vector<1x1x32x32xbf16> to vector<32x32xbf16>
    %cst_32 = arith.constant dense<0.000000e+00> : vector<16x32xf32>
    %39 = tpu.matmul %36, %38, %cst_32 {dimension_numbers = #tpu.dot_dimension_numbers<[1], [0], [0], [1], [0, 0, 1, 1], [], []>} : vector<16x32xbf16>, vector<32x32xbf16>, vector<16x32xf32> -> vector<16x32xf32>
    %c4 = arith.constant 4 : index
    %c0_33 = arith.constant 0 : index
    %40 = vector.load %arg3[%c4, %c0_33] : memref<6x32xf32, #tpu.memory_space<vmem>>, vector<1x32xf32>
    %41 = vector.broadcast %40 : vector<1x32xf32> to vector<16x32xf32>
    %42 = arith.addf %39, %41 : vector<16x32xf32>
    %cst_34 = arith.constant 0.000000e+00 : f32
    %43 = vector.broadcast %cst_34 : f32 to vector<16x32xf32>
    %44 = arith.maximumf %42, %43 : vector<16x32xf32>
    %45 = arith.truncf %44 : vector<16x32xf32> to vector<16x32xbf16>
    %c1_35 = arith.constant 1 : index
    %c2_36 = arith.constant 2 : index
    %c0_37 = arith.constant 0 : index
    %c0_38 = arith.constant 0 : index
    %46 = vector.load %arg2[%c1_35, %c2_36, %c0_37, %c0_38] : memref<2x3x32x32xbf16, #tpu.memory_space<vmem>>, vector<1x1x32x32xbf16>
    %47 = vector.shape_cast %46 : vector<1x1x32x32xbf16> to vector<32x32xbf16>
    %cst_39 = arith.constant dense<0.000000e+00> : vector<16x32xf32>
    %48 = tpu.matmul %45, %47, %cst_39 {dimension_numbers = #tpu.dot_dimension_numbers<[1], [0], [0], [1], [0, 0, 1, 1], [], []>} : vector<16x32xbf16>, vector<32x32xbf16>, vector<16x32xf32> -> vector<16x32xf32>
    %c5 = arith.constant 5 : index
    %c0_40 = arith.constant 0 : index
    %49 = vector.load %arg3[%c5, %c0_40] : memref<6x32xf32, #tpu.memory_space<vmem>>, vector<1x32xf32>
    %50 = vector.broadcast %49 : vector<1x32xf32> to vector<16x32xf32>
    %51 = arith.addf %48, %50 : vector<16x32xf32>
    %52 = arith.addf %26, %51 : vector<16x32xf32>
    %cst_41 = arith.constant dense<0.000000e+00> : vector<16xf32>
    %53 = vector.multi_reduction <add>, %52, %cst_41 [1] : vector<16x32xf32> to vector<16xf32>
    %54 = vector.shape_cast %53 : vector<16xf32> to vector<16x1xf32>
    %cst_42 = arith.constant 3.125000e-02 : f32
    %55 = vector.broadcast %cst_42 : f32 to vector<16x1xf32>
    %56 = arith.mulf %54, %55 : vector<16x1xf32>
    %57 = vector.broadcast %56 : vector<16x1xf32> to vector<16x32xf32>
    %58 = arith.subf %52, %57 : vector<16x32xf32>
    %59 = arith.mulf %58, %58 : vector<16x32xf32>
    %cst_43 = arith.constant dense<0.000000e+00> : vector<16xf32>
    %60 = vector.multi_reduction <add>, %59, %cst_43 [1] : vector<16x32xf32> to vector<16xf32>
    %61 = vector.shape_cast %60 : vector<16xf32> to vector<16x1xf32>
    %cst_44 = arith.constant 3.125000e-02 : f32
    %62 = vector.broadcast %cst_44 : f32 to vector<16x1xf32>
    %63 = arith.mulf %61, %62 : vector<16x1xf32>
    %cst_45 = arith.constant 9.99999974E-6 : f32
    %64 = vector.broadcast %cst_45 : f32 to vector<16x1xf32>
    %65 = arith.addf %63, %64 : vector<16x1xf32>
    %66 = math.rsqrt %65 : vector<16x1xf32>
    %67 = vector.broadcast %66 : vector<16x1xf32> to vector<16x32xf32>
    %68 = arith.mulf %58, %67 : vector<16x32xf32>
    %c0_46 = arith.constant 0 : index
    %c0_47 = arith.constant 0 : index
    %69 = vector.load %arg4[%c0_46, %c0_47] : memref<1x32xf32, #tpu.memory_space<vmem>>, vector<1x32xf32>
    %70 = vector.broadcast %69 : vector<1x32xf32> to vector<16x32xf32>
    %71 = arith.mulf %68, %70 : vector<16x32xf32>
    %c0_48 = arith.constant 0 : index
    %c0_49 = arith.constant 0 : index
    %72 = vector.load %arg5[%c0_48, %c0_49] : memref<1x32xf32, #tpu.memory_space<vmem>>, vector<1x32xf32>
    %73 = vector.broadcast %72 : vector<1x32xf32> to vector<16x32xf32>
    %74 = arith.addf %71, %73 : vector<16x32xf32>
    %c0_50 = arith.constant 0 : index
    %c0_51 = arith.constant 0 : index
    %75 = vector.load %arg6[%c0_50, %c0_51] : memref<16x32xf32, #tpu.memory_space<vmem>>, vector<16x32xf32>
    tpu.vector_store %arg6[%c0_50, %c0_51], %74 {strides = array<i32>} : memref<16x32xf32, #tpu.memory_space<vmem>>, vector<16x32xf32>,
    return
  }
  func.func @transform_0(%arg0: i32) -> (i32, i32) {
    %c0_i32 = arith.constant 0 : i32
    %c0_i32_0 = arith.constant 0 : i32
    return %arg0, %c0_i32 : i32, i32
  }
  func.func @transform_1(%arg0: i32) -> (i32, i32, i32, i32) {
    %c0_i32 = arith.constant 0 : i32
    %c0_i32_0 = arith.constant 0 : i32
    %c0_i32_1 = arith.constant 0 : i32
    %c0_i32_2 = arith.constant 0 : i32
    %c0_i32_3 = arith.constant 0 : i32
    return %c0_i32, %c0_i32_0, %c0_i32_1, %c0_i32_2 : i32, i32, i32, i32
  }
  func.func @transform_2(%arg0: i32) -> (i32, i32) {
    %c0_i32 = arith.constant 0 : i32
    %c0_i32_0 = arith.constant 0 : i32
    %c0_i32_1 = arith.constant 0 : i32
    return %c0_i32, %c0_i32_0 : i32, i32
  }
  func.func @transform_3(%arg0: i32) -> (i32, i32) {
    %c0_i32 = arith.constant 0 : i32
    %c0_i32_0 = arith.constant 0 : i32
    %c0_i32_1 = arith.constant 0 : i32
    return %c0_i32, %c0_i32_0 : i32, i32
  }
  func.func @transform_4(%arg0: i32) -> (i32, i32) {
    %c0_i32 = arith.constant 0 : i32
    %c0_i32_0 = arith.constant 0 : i32
    %c0_i32_1 = arith.constant 0 : i32
    return %c0_i32, %c0_i32_0 : i32, i32
  }
  func.func @transform_5(%arg0: i32) -> (i32, i32) {
    %c0_i32 = arith.constant 0 : i32
    %c0_i32_0 = arith.constant 0 : i32
    return %arg0, %c0_i32 : i32, i32
  }
}

</mosaic_0001>

<bundles_post_ra>
// kernel: tpu_custom_call.1
= control target key start
LH: loop header
LB: loop body
LE: loop exit
PB: predicated region body
PF: predicated region fallthrough
CT: control target
= control target key end

     0   :  { %10 = vsyncpa [#allocation3], 0  ;;  %s889_s0 = inlined_call_operand.hbm [shape: f32[16,32], index: 0, kind: input, shape index: {}]   ;;  %s890_s1 = inlined_call_operand.hbm [shape: bf16[2,3,32,32], index: 1, kind: input, shape index: {}]   ;;  %s891_s2 = inlined_call_operand.hbm [shape: f32[6,32], index: 2, kind: input, shape index: {}]   ;;  %s892_s3 = inlined_call_operand.vmem [shape: f32[1,32], index: 3, kind: input, shape index: {}]   ;;  %s893_s4 = inlined_call_operand.vmem [shape: f32[1,32], index: 4, kind: input, shape index: {}]   ;;  %s894_s5 = inlined_call_operand.hbm [shape: f32[16,32], index: 5, kind: output, shape index: {}]  }
   0x1   :  { %11 = vsyncpa [#allocation6], 0 }
   0x2   :  { %12 = vsyncpa [#allocation4], 0  ;;  %s753_s18 = smov [#allocation5]   ;;  %s659_s22 = scalar_lea.hbm %s890_s1, 1536 }
   0x3   :  { %s30_s19 = sshll.u32 %s753_s18, 4  ;;  %p660_p0 = scmp.ne.s32.totalorder %s890_s1, %s659_s22  ;;  %s31_s19 = int_to_ptr.vmem [resolvable:$true] %s30_s19 }
   0x4   :  { %p663_p1 = scmp.lt.u32.totalorder %s659_s22, %s890_s1 }
   0x6   :  { %p665_p2 = pnand %p663_p1, %p660_p0 }
   0x8   :  { %668 = shalt.err (!%p665_p2)
}
   0x9   :  { %s669_s27 = scalar_lea.vmem %s31_s19, 1536  ;;  %p674_p4 = scmp.lt.s32.totalorder %s31_s19, %s31_s19 }
   0xa   :  { %p670_p3 = scmp.ne.s32.totalorder %s31_s19, %s669_s27  ;;  %p675_p5 = scmp.lt.s32.totalorder %s669_s27, %s669_s27 }
   0xc   :  { %p676_p6 = por %p675_p5, %p674_p4 }
   0xe   :  { %p677_p7 = pnand %p676_p6, %p670_p3 }
  0x10   :  { %680 = shalt.err (!%p677_p7)
}
  0x11   :  { %s754_s28 = smov 64   ;;  %s755_s29 = smov 4  }
  0x12   :  { %36 = dma.hbm_to_vmem [thread:$0]  %s890_s1, 1536, %s31_s19, [#allocation6], %s754_s28, %s754_s28, %s755_s29  }
  0x13   :  { %s756_s7 = smov [#allocation2]   ;;  %s681_s11 = scalar_lea.hbm %s889_s0, 256 }
  0x14   :  { %s18_s8 = sshll.u32 %s756_s7, 4  ;;  %p682_p8 = scmp.ne.s32.totalorder %s889_s0, %s681_s11  ;;  %s19_s8 = int_to_ptr.vmem [resolvable:$true] %s18_s8 }
  0x15   :  { %p685_p9 = scmp.lt.u32.totalorder %s681_s11, %s889_s0 }
  0x17   :  { %p687_p10 = pnand %p685_p9, %p682_p8 }
  0x19   :  { %690 = shalt.err (!%p687_p10)
}
  0x1a   :  { %s691_s16 = scalar_lea.vmem %s19_s8, 256  ;;  %p696_p12 = scmp.lt.s32.totalorder %s19_s8, %s19_s8 }
  0x1b   :  { %p692_p11 = scmp.ne.s32.totalorder %s19_s8, %s691_s16  ;;  %p697_p13 = scmp.lt.s32.totalorder %s691_s16, %s691_s16 }
  0x1d   :  { %p698_p0 = por %p697_p13, %p696_p12 }
  0x1f   :  { %p699_p1 = pnand %p698_p0, %p692_p11 }
  0x21   :  { %702 = shalt.err (!%p699_p1)
}
  0x22   :  { %s757_s1 = smov 128   ;;  %s758_s17 = smov 8  }
  0x23   :  { %24 = dma.hbm_to_vmem [thread:$0]  %s889_s0, 256, %s19_s8, [#allocation3], %s757_s1, %s757_s1, %s758_s17  }
  0x24   :  { %s759_s20 = smov [#allocation7]   ;;  %s703_s24 = scalar_lea.hbm %s891_s2, 128 }
  0x25   :  { %s43_s21 = sshll.u32 %s759_s20, 4  ;;  %p704_p2 = scmp.ne.s32.totalorder %s891_s2, %s703_s24  ;;  %s44_s21 = int_to_ptr.vmem [resolvable:$true] %s43_s21 }
  0x26   :  { %p707_p3 = scmp.lt.u32.totalorder %s703_s24, %s891_s2 }
  0x28   :  { %p709_p4 = pnand %p707_p3, %p704_p2 }
  0x2a   :  { %712 = shalt.err (!%p709_p4)
}
  0x2b   :  { %s713_s29 = scalar_lea.vmem %s44_s21, 128  ;;  %p718_p6 = scmp.lt.s32.totalorder %s44_s21, %s44_s21 }
  0x2c   :  { %p714_p5 = scmp.ne.s32.totalorder %s44_s21, %s713_s29  ;;  %p719_p7 = scmp.lt.s32.totalorder %s713_s29, %s713_s29 }
  0x2e   :  { %p720_p8 = por %p719_p7, %p718_p6 }
  0x30   :  { %p721_p9 = pnand %p720_p8, %p714_p5 }
  0x32   :  { %724 = shalt.err (!%p721_p9)
}
  0x33   :  { %46 = dma.hbm_to_vmem [thread:$0]  %s891_s2, 128, %s44_s21, [#allocation6]  }
  0x34   :  { %747 = dma.done.wait [#allocation3], 256  }
  0x35   :  { %748 = vsyncadd [#allocation3], 4294967040 }
  0x36   :  { %749 = dma.done.wait [#allocation6], 1664  }
  0x37   :  { %750 = vsyncadd [#allocation6], 4294965632  ;;  %v760_v0 = vmov 0.0   ;;  %vm761_vm0 = vmmov 0   ;;  %v643_v1 = vld [vmem:[#allocation5] sm:$0xff]   ;;  %v644_v2 = vld [vmem:[#allocation5 + $0x8] sm:$0xff]  }
  0x38   :  { %585 = vmatprep.subr.bf16.mxu0 %v760_v0  ;;  %589 = vmatprep.mubr.msk.bf16.mxu0 %vm761_vm0, %v760_v0  ;;  %v61_v3 = vld [vmem:[#allocation2] sm:$0xff]  ;;  %v62_v4 = vld [vmem:[#allocation2 + $0x8] sm:$0xff]  ;;  %vm85_vm1 = vcmask 261120   ;;  %v541_v8 = vld [vmem:[#allocation7] ss:$0 sm:$0xff]  ;;  %s762_s9 = smov [#allocation8]  }
  0x39   :  { %593 = vmatprep.subr.bf16.mxu1 %v760_v0  ;;  %597 = vmatprep.mubr.msk.bf16.mxu1 %vm761_vm0, %v760_v0  ;;  %v63_v5 = vpack.c.bf16 %v62_v4, %v61_v3  ;;  %v645_v6 = vld [vmem:[#allocation5 + $0x10] sm:$0xff]   ;;  %v646_v7 = vld [vmem:[#allocation5 + $0x18] sm:$0xff]   ;;  %v647_v18 = vld [vmem:[#allocation5 + $0x20] sm:$0xff]   ;;  %s528_s10 = sshll.u32 %s762_s9, 4  ;;  %s529_s10 = int_to_ptr.vmem [resolvable:$true] %s528_s10 }
  0x3a   :  { %586 = vmatpush3.bf16.msra.mxu0 %v643_v1  ;;  %594 = vmatpush3.bf16.msra.mxu1 %v645_v6  ;;  %v648_v19 = vld [vmem:[#allocation5 + $0x28] sm:$0xff]   ;;  %v545_v20 = vld [vmem:[#allocation7 + $0x1] ss:$0 sm:$0xff]  ;;  %v649_v30 = vld [vmem:[#allocation5 + $0x30] sm:$0xff]   ;;  %s725_s11 = scalar_lea.vmem %s529_s10, 256  ;;  %p730_p11 = scmp.lt.s32.totalorder %s529_s10, %s529_s10 }
  0x3b   :  { %587 = vmatprep.subr.bf16.mxu0 %v760_v0  ;;  %595 = vmatprep.subr.bf16.mxu1 %v760_v0  ;;  %v650_v31 = vld [vmem:[#allocation5 + $0x38] sm:$0xff]   ;;  %v549_v32 = vld [vmem:[#allocation7 + $0x2] ss:$0 sm:$0xff]  ;;  %v652_v43 = vld [vmem:[#allocation5 + $0x48] sm:$0xff]   ;;  %p726_p10 = scmp.ne.s32.totalorder %s529_s10, %s725_s11  ;;  %p731_p12 = scmp.lt.s32.totalorder %s725_s11, %s725_s11 }
  0x3c   :  { %v651_v42 = vld [vmem:[#allocation5 + $0x40] sm:$0xff]   ;;  %v653_v54 = vld [vmem:[#allocation5 + $0x50] sm:$0xff]   ;;  %v654_v55 = vld [vmem:[#allocation5 + $0x58] sm:$0xff]  }
  0x3d   :  { %v553_v44 = vld [vmem:[#allocation7 + $0x3] ss:$0 sm:$0xff]  ;;  %v557_v56 = vld [vmem:[#allocation7 + $0x4] ss:$0 sm:$0xff]  ;;  %p732_p13 = por %p731_p12, %p730_p11 }
  0x3e   :  { %588 = vmatpush3.bf16.msra.mxu0 %v644_v2  ;;  %596 = vmatpush3.bf16.msra.mxu1 %v646_v7 }
  0x3f   :  { %601 = vmatprep.subr.bf16.mxu0 %v760_v0  ;;  %609 = vmatprep.subr.bf16.mxu1 %v760_v0  ;;  %p733_p0 = pnand %p732_p13, %p726_p10 }
  0x41   :  { %590 = vmatmul.mubr.msk.bf16.vlgmr.msra.gmra.mrb[0].mxu0 %vm85_vm1, %v63_v5 }
  0x42   :  { %605 = vmatprep.mubr.msk.bf16.mxu0 %vm761_vm0, %v760_v0  ;;  %602 = vmatpush3.bf16.msra.mxu0 %v647_v18 }
  0x43   :  { %603 = vmatprep.subr.bf16.mxu0 %v760_v0 }
  0x46   :  { %604 = vmatpush3.bf16.msra.mxu0 %v648_v19 }
  0x47   :  { %617 = vmatprep.subr.bf16.mxu0 %v760_v0 }
 0x114   :  { %v123_v9 = vpop.f32.mrb[0].mxu0 }
 0x115   :  { %v124_v10 = vadd.f32 %v541_v8, %v123_v9  ;;  %v591_v11 = vpop.f32.mrb[1].mxu0 }
 0x116   :  { %v126_v12 = vpop.f32.mrb[2].mxu0 }
 0x117   :  { %v127_v13 = vadd.f32 %v541_v8, %v126_v12  ;;  %v592_v14 = vpop.f32.mrb[3].mxu0  ;;  %v130_v15 = vmax.f32 %v124_v10, 0.0 }
 0x119   :  { %v131_v16 = vmax.f32 %v127_v13, 0.0 }
 0x11b   :  { %v132_v17 = vpack.c.bf16 %v131_v16, %v130_v15 }
 0x11d   :  { %598 = vmatmul.mubr.msk.bf16.vlgmr.msra.gmra.mrb[0].mxu1 %vm85_vm1, %v132_v17 }
 0x11e   :  { %613 = vmatprep.mubr.msk.bf16.mxu1 %vm761_vm0, %v760_v0  ;;  %610 = vmatpush3.bf16.msra.mxu1 %v649_v30  ;;  %v565_v30 = vld [vmem:[%s892_s3] ss:$0 sm:$0xff] }
 0x11f   :  { %611 = vmatprep.subr.bf16.mxu1 %v760_v0 }
 0x122   :  { %612 = vmatpush3.bf16.msra.mxu1 %v650_v31 }
 0x123   :  { %625 = vmatprep.subr.bf16.mxu1 %v760_v0 }
 0x1f0   :  { %v192_v21 = vpop.f32.mrb[0].mxu1 }
 0x1f1   :  { %v193_v22 = vadd.f32 %v545_v20, %v192_v21  ;;  %v599_v23 = vpop.f32.mrb[1].mxu1 }
 0x1f2   :  { %v195_v24 = vpop.f32.mrb[2].mxu1 }
 0x1f3   :  { %v196_v25 = vadd.f32 %v545_v20, %v195_v24  ;;  %v600_v26 = vpop.f32.mrb[3].mxu1  ;;  %v199_v27 = vmax.f32 %v193_v22, 0.0 }
 0x1f5   :  { %v200_v28 = vmax.f32 %v196_v25, 0.0 }
 0x1f7   :  { %v201_v29 = vpack.c.bf16 %v200_v28, %v199_v27 }
 0x1f9   :  { %606 = vmatmul.mubr.msk.bf16.vlgmr.msra.gmra.mrb[4].mxu0 %vm85_vm1, %v201_v29 }
 0x1fa   :  { %621 = vmatprep.mubr.msk.bf16.mxu0 %vm761_vm0, %v760_v0  ;;  %618 = vmatpush3.bf16.msra.mxu0 %v651_v42 }
 0x1fb   :  { %619 = vmatprep.subr.bf16.mxu0 %v760_v0 }
 0x1fe   :  { %620 = vmatpush3.bf16.msra.mxu0 %v652_v43 }
 0x2cc   :  { %v261_v33 = vpop.f32.mrb[4].mxu0 }
 0x2cd   :  { %v262_v34 = vadd.f32 %v549_v32, %v261_v33  ;;  %v607_v35 = vpop.f32.mrb[5].mxu0 }
 0x2ce   :  { %v264_v36 = vpop.f32.mrb[6].mxu0 }
 0x2cf   :  { %v265_v37 = vadd.f32 %v549_v32, %v264_v36  ;;  %v608_v38 = vpop.f32.mrb[7].mxu0  ;;  %v268_v39 = vadd.f32 %v262_v34, %v61_v3  ;;  %v561_v3 = vld [vmem:[#allocation7 + $0x5] ss:$0 sm:$0xff]  ;;  %v566_v32 = vld [vmem:[%s893_s4] ss:$0 sm:$0xff] }
 0x2d1   :  { %v269_v40 = vadd.f32 %v265_v37, %v62_v4 }
 0x2d3   :  { %v270_v41 = vpack.c.bf16 %v269_v40, %v268_v39 }
 0x2d5   :  { %614 = vmatmul.mubr.msk.bf16.vlgmr.msra.gmra.mrb[4].mxu1 %vm85_vm1, %v270_v41 }
 0x2d6   :  { %629 = vmatprep.mubr.msk.bf16.mxu1 %vm761_vm0, %v760_v0  ;;  %626 = vmatpush3.bf16.msra.mxu1 %v653_v54 }
 0x2d7   :  { %627 = vmatprep.subr.bf16.mxu1 %v760_v0 }
 0x2da   :  { %628 = vmatpush3.bf16.msra.mxu1 %v654_v55 }
 0x3a8   :  { %v330_v45 = vpop.f32.mrb[4].mxu1 }
 0x3a9   :  { %v331_v46 = vadd.f32 %v553_v44, %v330_v45  ;;  %v615_v47 = vpop.f32.mrb[5].mxu1 }
 0x3aa   :  { %v333_v48 = vpop.f32.mrb[6].mxu1 }
 0x3ab   :  { %v334_v49 = vadd.f32 %v553_v44, %v333_v48  ;;  %v616_v50 = vpop.f32.mrb[7].mxu1  ;;  %v337_v51 = vmax.f32 %v331_v46, 0.0 }
 0x3ad   :  { %v338_v52 = vmax.f32 %v334_v49, 0.0 }
 0x3af   :  { %v339_v53 = vpack.c.bf16 %v338_v52, %v337_v51 }
 0x3b1   :  { %622 = vmatmul.mubr.msk.bf16.vlgmr.msra.gmra.mrb[8].mxu0 %vm85_vm1, %v339_v53 }
 0x484   :  { %v399_v57 = vpop.f32.mrb[8].mxu0 }
 0x485   :  { %v400_v58 = vadd.f32 %v557_v56, %v399_v57  ;;  %v623_v59 = vpop.f32.mrb[9].mxu0 }
 0x486   :  { %v402_v60 = vpop.f32.mrb[10].mxu0 }
 0x487   :  { %v403_v61 = vadd.f32 %v557_v56, %v402_v60  ;;  %v624_v62 = vpop.f32.mrb[11].mxu0  ;;  %v406_v63 = vmax.f32 %v400_v58, 0.0 }
 0x489   :  { %v407_v1 = vmax.f32 %v403_v61, 0.0 }
 0x48b   :  { %v408_v2 = vpack.c.bf16 %v407_v1, %v406_v63 }
 0x48d   :  { %630 = vmatmul.mubr.msk.bf16.vlgmr.msra.gmra.mrb[8].mxu1 %vm85_vm1, %v408_v2 }
 0x560   :  { %v468_v4 = vpop.f32.mrb[8].mxu1 }
 0x561   :  { %v469_v5 = vadd.f32 %v561_v3, %v468_v4  ;;  %v631_v6 = vpop.f32.mrb[9].mxu1 }
 0x562   :  { %v471_v7 = vpop.f32.mrb[10].mxu1 }
 0x563   :  { %v472_v0 = vadd.f32 %v561_v3, %v471_v7  ;;  %v632_v8 = vpop.f32.mrb[11].mxu1  ;;  %v475_v9 = vadd.f32 %v469_v5, %v268_v39 }
 0x565   :  { %v477_v10 = vsel %vm85_vm1, %v475_v9, 0.0  ;;  %v476_v11 = vadd.f32 %v472_v0, %v269_v40 }
 0x566   :  { %478 = vadd.xlane.f32.xlu0 %v477_v10 }
 0x567   :  { %v480_v12 = vsel %vm85_vm1, %v476_v11, 0.0 }
 0x56a   :  { %481 = vadd.xlane.f32.xlu0 %v480_v12 }
 0x5f3   :  { %v479_v13 = vpop.xlane.xlu0 %478 }
 0x5f4   :  { %v483_v14 = vmul.f32 0.03125, %v479_v13 }
 0x5f6   :  { %v485_v15 = vsub.f32 %v475_v9, %v483_v14 }
 0x5f7   :  { %v482_v16 = vpop.xlane.xlu0 %481 }
 0x5f8   :  { %v484_v17 = vmul.f32 0.03125, %v482_v16  ;;  %v487_v18 = vmul.f32 %v485_v15, %v485_v15 }
 0x5fa   :  { %v486_v19 = vsub.f32 %v476_v11, %v484_v17  ;;  %v489_v20 = vsel %vm85_vm1, %v487_v18, 0.0 }
 0x5fb   :  { %490 = vadd.xlane.f32.xlu1 %v489_v20 }
 0x5fc   :  { %v488_v21 = vmul.f32 %v486_v19, %v486_v19 }
 0x5fe   :  { %v492_v22 = vsel %vm85_vm1, %v488_v21, 0.0 }
 0x5ff   :  { %493 = vadd.xlane.f32.xlu1 %v492_v22 }
 0x688   :  { %v491_v23 = vpop.xlane.xlu1 %490 }
 0x689   :  { %v495_v24 = vmul.f32 0.03125, %v491_v23 }
 0x68b   :  { %v497_v25 = vadd.f32 1e-05, %v495_v24 }
 0x68c   :  { %v494_v26 = vpop.xlane.xlu1 %493 }
 0x68d   :  { %655 = vrsqrt.f32 %v497_v25  ;;  %v496_v27 = vmul.f32 0.03125, %v494_v26 }
 0x68f   :  { %v498_v28 = vadd.f32 1e-05, %v496_v27 }
 0x691   :  { %657 = vrsqrt.f32 %v498_v28 }
 0x697   :  { %v656_v29 = vpop.eup %655 }
 0x698   :  { %v501_v31 = vmul.f32 %v656_v29, %v485_v15 }
 0x69a   :  { %v510_v33 = vmul.f32 %v565_v30, %v501_v31 }
 0x69b   :  { %v658_v34 = vpop.eup %657 }
 0x69c   :  { %v502_v35 = vmul.f32 %v658_v34, %v486_v19  ;;  %v519_v36 = vadd.f32 %v566_v32, %v510_v33 }
 0x69e   :  { %v511_v37 = vmul.f32 %v565_v30, %v502_v35  ;;  %521 = vst.msk [vmem:[#allocation8] sm:$0xff] %vm85_vm1, %v519_v36 }
 0x6a0   :  { %v520_v38 = vadd.f32 %v566_v32, %v511_v37 }
 0x6a2   :  { %522 = vst.msk [vmem:[#allocation8 + $0x8] sm:$0xff] %vm85_vm1, %v520_v38 }
 0x6a3   :  { %736 = shalt.err (!%p733_p0)
}
 0x6a4   :  { %s737_s12 = scalar_lea.hbm %s894_s5, 256 }
 0x6a5   :  { %p738_p1 = scmp.ne.s32.totalorder %s894_s5, %s737_s12  ;;  %p741_p2 = scmp.lt.u32.totalorder %s737_s12, %s894_s5 }
 0x6a7   :  { %p743_p3 = pnand %p741_p2, %p738_p1 }
 0x6a9   :  { %746 = shalt.err (!%p743_p3)
}
 0x6aa   :  { %534 = dma.vmem_to_hbm [thread:$0]  %s529_s10, 256, %s894_s5, [#allocation4], %s757_s1, %s757_s1, %s758_s17  }
 0x6ab   :  { %751 = dma.done.wait [#allocation4], 256  }
 0x6ac   :  { %752 = vsyncadd [#allocation4], 4294967040 }
 0x6ad   :  { %538 = vsyncpa [#allocation3], 1 }
 0x6ae   :  { %539 = vsyncpa [#allocation6], 1 }
 0x6af   :  { %540 = vsyncpa [#allocation4], 1 }

// kernel: tpu_custom_call.1
= control target key start
LH: loop header
LB: loop body
LE: loop exit
PB: predicated region body
PF: predicated region fallthrough
CT: control target
= control target key end

     0   :  { %10 = vsyncpa [#allocation3], 0  ;;  %s889_s0 = inlined_call_operand.hbm [shape: f32[16,32], index: 0, kind: input, shape index: {}]   ;;  %s890_s1 = inlined_call_operand.hbm [shape: bf16[2,3,32,32], index: 1, kind: input, shape index: {}]   ;;  %s891_s2 = inlined_call_operand.hbm [shape: f32[6,32], index: 2, kind: input, shape index: {}]   ;;  %s892_s3 = inlined_call_operand.vmem [shape: f32[1,32], index: 3, kind: input, shape index: {}]   ;;  %s893_s4 = inlined_call_operand.vmem [shape: f32[1,32], index: 4, kind: input, shape index: {}]   ;;  %s894_s5 = inlined_call_operand.hbm [shape: f32[16,32], index: 5, kind: output, shape index: {}]  }
   0x1   :  { %11 = vsyncpa [#allocation6], 0 }
   0x2   :  { %12 = vsyncpa [#allocation4], 0  ;;  %s753_s18 = smov [#allocation5]   ;;  %s659_s22 = scalar_lea.hbm %s890_s1, 1536 }
   0x3   :  { %s30_s19 = sshll.u32 %s753_s18, 4  ;;  %p660_p0 = scmp.ne.s32.totalorder %s890_s1, %s659_s22  ;;  %s31_s19 = int_to_ptr.vmem [resolvable:$true] %s30_s19 }
   0x4   :  { %p663_p1 = scmp.lt.u32.totalorder %s659_s22, %s890_s1 }
   0x6   :  { %p665_p2 = pnand %p663_p1, %p660_p0 }
   0x8   :  { %668 = shalt.err (!%p665_p2)
}
   0x9   :  { %s669_s27 = scalar_lea.vmem %s31_s19, 1536  ;;  %p674_p4 = scmp.lt.s32.totalorder %s31_s19, %s31_s19 }
   0xa   :  { %p670_p3 = scmp.ne.s32.totalorder %s31_s19, %s669_s27  ;;  %p675_p5 = scmp.lt.s32.totalorder %s669_s27, %s669_s27 }
   0xc   :  { %p676_p6 = por %p675_p5, %p674_p4 }
   0xe   :  { %p677_p7 = pnand %p676_p6, %p670_p3 }
  0x10   :  { %680 = shalt.err (!%p677_p7)
}
  0x11   :  { %s754_s28 = smov 64   ;;  %s755_s29 = smov 4  }
  0x12   :  { %36 = dma.hbm_to_vmem [thread:$0]  %s890_s1, 1536, %s31_s19, [#allocation6], %s754_s28, %s754_s28, %s755_s29  }
  0x13   :  { %s756_s7 = smov [#allocation2]   ;;  %s681_s11 = scalar_lea.hbm %s889_s0, 256 }
  0x14   :  { %s18_s8 = sshll.u32 %s756_s7, 4  ;;  %p682_p8 = scmp.ne.s32.totalorder %s889_s0, %s681_s11  ;;  %s19_s8 = int_to_ptr.vmem [resolvable:$true] %s18_s8 }
  0x15   :  { %p685_p9 = scmp.lt.u32.totalorder %s681_s11, %s889_s0 }
  0x17   :  { %p687_p10 = pnand %p685_p9, %p682_p8 }
  0x19   :  { %690 = shalt.err (!%p687_p10)
}
  0x1a   :  { %s691_s16 = scalar_lea.vmem %s19_s8, 256  ;;  %p696_p12 = scmp.lt.s32.totalorder %s19_s8, %s19_s8 }
  0x1b   :  { %p692_p11 = scmp.ne.s32.totalorder %s19_s8, %s691_s16  ;;  %p697_p13 = scmp.lt.s32.totalorder %s691_s16, %s691_s16 }
  0x1d   :  { %p698_p0 = por %p697_p13, %p696_p12 }
  0x1f   :  { %p699_p1 = pnand %p698_p0, %p692_p11 }
  0x21   :  { %702 = shalt.err (!%p699_p1)
}
  0x22   :  { %s757_s1 = smov 128   ;;  %s758_s17 = smov 8  }
  0x23   :  { %24 = dma.hbm_to_vmem [thread:$0]  %s889_s0, 256, %s19_s8, [#allocation3], %s757_s1, %s757_s1, %s758_s17  }
  0x24   :  { %s759_s20 = smov [#allocation7]   ;;  %s703_s24 = scalar_lea.hbm %s891_s2, 128 }
  0x25   :  { %s43_s21 = sshll.u32 %s759_s20, 4  ;;  %p704_p2 = scmp.ne.s32.totalorder %s891_s2, %s703_s24  ;;  %s44_s21 = int_to_ptr.vmem [resolvable:$true] %s43_s21 }
  0x26   :  { %p707_p3 = scmp.lt.u32.totalorder %s703_s24, %s891_s2 }
  0x28   :  { %p709_p4 = pnand %p707_p3, %p704_p2 }
  0x2a   :  { %712 = shalt.err (!%p709_p4)
}
  0x2b   :  { %s713_s29 = scalar_lea.vmem %s44_s21, 128  ;;  %p718_p6 = scmp.lt.s32.totalorder %s44_s21, %s44_s21 }
  0x2c   :  { %p714_p5 = scmp.ne.s32.totalorder %s44_s21, %s713_s29  ;;  %p719_p7 = scmp.lt.s32.totalorder %s713_s29, %s713_s29 }
  0x2e   :  { %p720_p8 = por %p719_p7, %p718_p6 }
  0x30   :  { %p721_p9 = pnand %p720_p8, %p714_p5 }
  0x32   :  { %724 = shalt.err (!%p721_p9)
}
  0x33   :  { %46 = dma.hbm_to_vmem [thread:$0]  %s891_s2, 128, %s44_s21, [#allocation6]  }
  0x34   :  { %747 = dma.done.wait [#allocation3], 256  }
  0x35   :  { %748 = vsyncadd [#allocation3], 4294967040 }
  0x36   :  { %749 = dma.done.wait [#allocation6], 1664  }
  0x37   :  { %750 = vsyncadd [#allocation6], 4294965632  ;;  %v760_v0 = vmov 0.0   ;;  %vm761_vm0 = vmmov 0   ;;  %v643_v1 = vld [vmem:[#allocation5] sm:$0xff]   ;;  %v644_v2 = vld [vmem:[#allocation5 + $0x8] sm:$0xff]  }
  0x38   :  { %585 = vmatprep.subr.bf16.mxu0 %v760_v0  ;;  %589 = vmatprep.mubr.msk.bf16.mxu0 %vm761_vm0, %v760_v0  ;;  %v61_v3 = vld [vmem:[#allocation2] sm:$0xff]  ;;  %v62_v4 = vld [vmem:[#allocation2 + $0x8] sm:$0xff]  ;;  %vm85_vm1 = vcmask 261120   ;;  %v541_v8 = vld [vmem:[#allocation7] ss:$0 sm:$0xff]  ;;  %s762_s9 = smov [#allocation8]  }
  0x39   :  { %593 = vmatprep.subr.bf16.mxu1 %v760_v0  ;;  %597 = vmatprep.mubr.msk.bf16.mxu1 %vm761_vm0, %v760_v0  ;;  %v63_v5 = vpack.c.bf16 %v62_v4, %v61_v3  ;;  %v645_v6 = vld [vmem:[#allocation5 + $0x10] sm:$0xff]   ;;  %v646_v7 = vld [vmem:[#allocation5 + $0x18] sm:$0xff]   ;;  %v647_v18 = vld [vmem:[#allocation5 + $0x20] sm:$0xff]   ;;  %s528_s10 = sshll.u32 %s762_s9, 4  ;;  %s529_s10 = int_to_ptr.vmem [resolvable:$true] %s528_s10 }
  0x3a   :  { %586 = vmatpush3.bf16.msra.mxu0 %v643_v1  ;;  %594 = vmatpush3.bf16.msra.mxu1 %v645_v6  ;;  %v648_v19 = vld [vmem:[#allocation5 + $0x28] sm:$0xff]   ;;  %v545_v20 = vld [vmem:[#allocation7 + $0x1] ss:$0 sm:$0xff]  ;;  %v649_v30 = vld [vmem:[#allocation5 + $0x30] sm:$0xff]   ;;  %s725_s11 = scalar_lea.vmem %s529_s10, 256  ;;  %p730_p11 = scmp.lt.s32.totalorder %s529_s10, %s529_s10 }
  0x3b   :  { %587 = vmatprep.subr.bf16.mxu0 %v760_v0  ;;  %595 = vmatprep.subr.bf16.mxu1 %v760_v0  ;;  %v650_v31 = vld [vmem:[#allocation5 + $0x38] sm:$0xff]   ;;  %v549_v32 = vld [vmem:[#allocation7 + $0x2] ss:$0 sm:$0xff]  ;;  %v652_v43 = vld [vmem:[#allocation5 + $0x48] sm:$0xff]   ;;  %p726_p10 = scmp.ne.s32.totalorder %s529_s10, %s725_s11  ;;  %p731_p12 = scmp.lt.s32.totalorder %s725_s11, %s725_s11 }
  0x3c   :  { %v651_v42 = vld [vmem:[#allocation5 + $0x40] sm:$0xff]   ;;  %v653_v54 = vld [vmem:[#allocation5 + $0x50] sm:$0xff]   ;;  %v654_v55 = vld [vmem:[#allocation5 + $0x58] sm:$0xff]  }
  0x3d   :  { %v553_v44 = vld [vmem:[#allocation7 + $0x3] ss:$0 sm:$0xff]  ;;  %v557_v56 = vld [vmem:[#allocation7 + $0x4] ss:$0 sm:$0xff]  ;;  %p732_p13 = por %p731_p12, %p730_p11 }
  0x3e   :  { %588 = vmatpush3.bf16.msra.mxu0 %v644_v2  ;;  %596 = vmatpush3.bf16.msra.mxu1 %v646_v7 }
  0x3f   :  { %601 = vmatprep.subr.bf16.mxu0 %v760_v0  ;;  %609 = vmatprep.subr.bf16.mxu1 %v760_v0  ;;  %p733_p0 = pnand %p732_p13, %p726_p10 }
  0x41   :  { %590 = vmatmul.mubr.msk.bf16.vlgmr.msra.gmra.mrb[0].mxu0 %vm85_vm1, %v63_v5 }
  0x42   :  { %605 = vmatprep.mubr.msk.bf16.mxu0 %vm761_vm0, %v760_v0  ;;  %602 = vmatpush3.bf16.msra.mxu0 %v647_v18 }
  0x43   :  { %603 = vmatprep.subr.bf16.mxu0 %v760_v0 }
  0x46   :  { %604 = vmatpush3.bf16.msra.mxu0 %v648_v19 }
  0x47   :  { %617 = vmatprep.subr.bf16.mxu0 %v760_v0 }
 0x114   :  { %v123_v9 = vpop.f32.mrb[0].mxu0 }
 0x115   :  { %v124_v10 = vadd.f32 %v541_v8, %v123_v9  ;;  %v591_v11 = vpop.f32.mrb[1].mxu0 }
 0x116   :  { %v126_v12 = vpop.f32.mrb[2].mxu0 }
 0x117   :  { %v127_v13 = vadd.f32 %v541_v8, %v126_v12  ;;  %v592_v14 = vpop.f32.mrb[3].mxu0  ;;  %v130_v15 = vmax.f32 %v124_v10, 0.0 }
 0x119   :  { %v131_v16 = vmax.f32 %v127_v13, 0.0 }
 0x11b   :  { %v132_v17 = vpack.c.bf16 %v131_v16, %v130_v15 }
 0x11d   :  { %598 = vmatmul.mubr.msk.bf16.vlgmr.msra.gmra.mrb[0].mxu1 %vm85_vm1, %v132_v17 }
 0x11e   :  { %613 = vmatprep.mubr.msk.bf16.mxu1 %vm761_vm0, %v760_v0  ;;  %610 = vmatpush3.bf16.msra.mxu1 %v649_v30  ;;  %v565_v30 = vld [vmem:[%s892_s3] ss:$0 sm:$0xff] }
 0x11f   :  { %611 = vmatprep.subr.bf16.mxu1 %v760_v0 }
 0x122   :  { %612 = vmatpush3.bf16.msra.mxu1 %v650_v31 }
 0x123   :  { %625 = vmatprep.subr.bf16.mxu1 %v760_v0 }
 0x1f0   :  { %v192_v21 = vpop.f32.mrb[0].mxu1 }
 0x1f1   :  { %v193_v22 = vadd.f32 %v545_v20, %v192_v21  ;;  %v599_v23 = vpop.f32.mrb[1].mxu1 }
 0x1f2   :  { %v195_v24 = vpop.f32.mrb[2].mxu1 }
 0x1f3   :  { %v196_v25 = vadd.f32 %v545_v20, %v195_v24  ;;  %v600_v26 = vpop.f32.mrb[3].mxu1  ;;  %v199_v27 = vmax.f32 %v193_v22, 0.0 }
 0x1f5   :  { %v200_v28 = vmax.f32 %v196_v25, 0.0 }
 0x1f7   :  { %v201_v29 = vpack.c.bf16 %v200_v28, %v199_v27 }
 0x1f9   :  { %606 = vmatmul.mubr.msk.bf16.vlgmr.msra.gmra.mrb[4].mxu0 %vm85_vm1, %v201_v29 }
 0x1fa   :  { %621 = vmatprep.mubr.msk.bf16.mxu0 %vm761_vm0, %v760_v0  ;;  %618 = vmatpush3.bf16.msra.mxu0 %v651_v42 }
 0x1fb   :  { %619 = vmatprep.subr.bf16.mxu0 %v760_v0 }
 0x1fe   :  { %620 = vmatpush3.bf16.msra.mxu0 %v652_v43 }
 0x2cc   :  { %v261_v33 = vpop.f32.mrb[4].mxu0 }
 0x2cd   :  { %v262_v34 = vadd.f32 %v549_v32, %v261_v33  ;;  %v607_v35 = vpop.f32.mrb[5].mxu0 }
 0x2ce   :  { %v264_v36 = vpop.f32.mrb[6].mxu0 }
 0x2cf   :  { %v265_v37 = vadd.f32 %v549_v32, %v264_v36  ;;  %v608_v38 = vpop.f32.mrb[7].mxu0  ;;  %v268_v39 = vadd.f32 %v262_v34, %v61_v3  ;;  %v561_v3 = vld [vmem:[#allocation7 + $0x5] ss:$0 sm:$0xff]  ;;  %v566_v32 = vld [vmem:[%s893_s4] ss:$0 sm:$0xff] }
 0x2d1   :  { %v269_v40 = vadd.f32 %v265_v37, %v62_v4 }
 0x2d3   :  { %v270_v41 = vpack.c.bf16 %v269_v40, %v268_v39 }
 0x2d5   :  { %614 = vmatmul.mubr.msk.bf16.vlgmr.msra.gmra.mrb[4].mxu1 %vm85_vm1, %v270_v41 }
 0x2d6   :  { %629 = vmatprep.mubr.msk.bf16.mxu1 %vm761_vm0, %v760_v0  ;;  %626 = vmatpush3.bf16.msra.mxu1 %v653_v54 }
 0x2d7   :  { %627 = vmatprep.subr.bf16.mxu1 %v760_v0 }
 0x2da   :  { %628 = vmatpush3.bf16.msra.mxu1 %v654_v55 }
 0x3a8   :  { %v330_v45 = vpop.f32.mrb[4].mxu1 }
 0x3a9   :  { %v331_v46 = vadd.f32 %v553_v44, %v330_v45  ;;  %v615_v47 = vpop.f32.mrb[5].mxu1 }
 0x3aa   :  { %v333_v48 = vpop.f32.mrb[6].mxu1 }
 0x3ab   :  { %v334_v49 = vadd.f32 %v553_v44, %v333_v48  ;;  %v616_v50 = vpop.f32.mrb[7].mxu1  ;;  %v337_v51 = vmax.f32 %v331_v46, 0.0 }
 0x3ad   :  { %v338_v52 = vmax.f32 %v334_v49, 0.0 }
 0x3af   :  { %v339_v53 = vpack.c.bf16 %v338_v52, %v337_v51 }
 0x3b1   :  { %622 = vmatmul.mubr.msk.bf16.vlgmr.msra.gmra.mrb[8].mxu0 %vm85_vm1, %v339_v53 }
 0x484   :  { %v399_v57 = vpop.f32.mrb[8].mxu0 }
 0x485   :  { %v400_v58 = vadd.f32 %v557_v56, %v399_v57  ;;  %v623_v59 = vpop.f32.mrb[9].mxu0 }
 0x486   :  { %v402_v60 = vpop.f32.mrb[10].mxu0 }
 0x487   :  { %v403_v61 = vadd.f32 %v557_v56, %v402_v60  ;;  %v624_v62 = vpop.f32.mrb[11].mxu0  ;;  %v406_v63 = vmax.f32 %v400_v58, 0.0 }
 0x489   :  { %v407_v1 = vmax.f32 %v403_v61, 0.0 }
 0x48b   :  { %v408_v2 = vpack.c.bf16 %v407_v1, %v406_v63 }
 0x48d   :  { %630 = vmatmul.mubr.msk.bf16.vlgmr.msra.gmra.mrb[8].mxu1 %vm85_vm1, %v408_v2 }
 0x560   :  { %v468_v4 = vpop.f32.mrb[8].mxu1 }
 0x561   :  { %v469_v5 = vadd.f32 %v561_v3, %v468_v4  ;;  %v631_v6 = vpop.f32.mrb[9].mxu1 }
 0x562   :  { %v471_v7 = vpop.f32.mrb[10].mxu1 }
 0x563   :  { %v472_v0 = vadd.f32 %v561_v3, %v471_v7  ;;  %v632_v8 = vpop.f32.mrb[11].mxu1  ;;  %v475_v9 = vadd.f32 %v469_v5, %v268_v39 }
 0x565   :  { %v477_v10 = vsel %vm85_vm1, %v475_v9, 0.0  ;;  %v476_v11 = vadd.f32 %v472_v0, %v269_v40 }
 0x566   :  { %478 = vadd.xlane.f32.xlu0 %v477_v10 }
 0x567   :  { %v480_v12 = vsel %vm85_vm1, %v476_v11, 0.0 }
 0x56a   :  { %481 = vadd.xlane.f32.xlu0 %v480_v12 }
 0x5f3   :  { %v479_v13 = vpop.xlane.xlu0 %478 }
 0x5f4   :  { %v483_v14 = vmul.f32 0.03125, %v479_v13 }
 0x5f6   :  { %v485_v15 = vsub.f32 %v475_v9, %v483_v14 }
 0x5f7   :  { %v482_v16 = vpop.xlane.xlu0 %481 }
 0x5f8   :  { %v484_v17 = vmul.f32 0.03125, %v482_v16  ;;  %v487_v18 = vmul.f32 %v485_v15, %v485_v15 }
 0x5fa   :  { %v486_v19 = vsub.f32 %v476_v11, %v484_v17  ;;  %v489_v20 = vsel %vm85_vm1, %v487_v18, 0.0 }
 0x5fb   :  { %490 = vadd.xlane.f32.xlu1 %v489_v20 }
 0x5fc   :  { %v488_v21 = vmul.f32 %v486_v19, %v486_v19 }
 0x5fe   :  { %v492_v22 = vsel %vm85_vm1, %v488_v21, 0.0 }
 0x5ff   :  { %493 = vadd.xlane.f32.xlu1 %v492_v22 }
 0x688   :  { %v491_v23 = vpop.xlane.xlu1 %490 }
 0x689   :  { %v495_v24 = vmul.f32 0.03125, %v491_v23 }
 0x68b   :  { %v497_v25 = vadd.f32 1e-05, %v495_v24 }
 0x68c   :  { %v494_v26 = vpop.xlane.xlu1 %493 }
 0x68d   :  { %655 = vrsqrt.f32 %v497_v25  ;;  %v496_v27 = vmul.f32 0.03125, %v494_v26 }
 0x68f   :  { %v498_v28 = vadd.f32 1e-05, %v496_v27 }
 0x691   :  { %657 = vrsqrt.f32 %v498_v28 }
 0x697   :  { %v656_v29 = vpop.eup %655 }
 0x698   :  { %v501_v31 = vmul.f32 %v656_v29, %v485_v15 }
 0x69a   :  { %v510_v33 = vmul.f32 %v565_v30, %v501_v31 }
 0x69b   :  { %v658_v34 = vpop.eup %657 }
 0x69c   :  { %v502_v35 = vmul.f32 %v658_v34, %v486_v19  ;;  %v519_v36 = vadd.f32 %v566_v32, %v510_v33 }
 0x69e   :  { %v511_v37 = vmul.f32 %v565_v30, %v502_v35  ;;  %521 = vst.msk [vmem:[#allocation8] sm:$0xff] %vm85_vm1, %v519_v36 }
 0x6a0   :  { %v520_v38 = vadd.f32 %v566_v32, %v511_v37 }
 0x6a2   :  { %522 = vst.msk [vmem:[#allocation8 + $0x8] sm:$0xff] %vm85_vm1, %v520_v38 }
 0x6a3   :  { %736 = shalt.err (!%p733_p0)
}
 0x6a4   :  { %s737_s12 = scalar_lea.hbm %s894_s5, 256 }
 0x6a5   :  { %p738_p1 = scmp.ne.s32.totalorder %s894_s5, %s737_s12  ;;  %p741_p2 = scmp.lt.u32.totalorder %s737_s12, %s894_s5 }
 0x6a7   :  { %p743_p3 = pnand %p741_p2, %p738_p1 }
 0x6a9   :  { %746 = shalt.err (!%p743_p3)
}
 0x6aa   :  { %534 = dma.vmem_to_hbm [thread:$0]  %s529_s10, 256, %s894_s5, [#allocation4], %s757_s1, %s757_s1, %s758_s17  }
 0x6ab   :  { %751 = dma.done.wait [#allocation4], 256  }
 0x6ac   :  { %752 = vsyncadd [#allocation4], 4294967040 }
 0x6ad   :  { %538 = vsyncpa [#allocation3], 1 }
 0x6ae   :  { %539 = vsyncpa [#allocation6], 1 }
 0x6af   :  { %540 = vsyncpa [#allocation4], 1 }

</bundles_post_ra>
